<compile_context>
chip_gen: v6e
topology: v6e:2x2x1
jax: 0.10.0
libtpu: 0.0.40
codegen_flags: <defaults>
</compile_context>

<pallas_src>
import jax
import jax.numpy as jnp
from jax.experimental import pallas as pl
from jax.experimental.pallas import tpu as pltpu


def _round_up(x, m):
    return (x + m - 1) // m * m


def make_mlp_kernel(num_weights):
    """Kernel applying `num_weights` bias-free Linear layers with fused ReLU
    between all but the last (matches the PyTorch module)."""

    def kernel(*refs):
        x_ref = refs[0]
        w_refs = refs[1:1 + num_weights]
        o_ref = refs[1 + num_weights]

        h = x_ref[...]                                   # bf16 (tile_m, in_p)
        for i, w_ref in enumerate(w_refs):
            # Weights are already (in, out): straight MXU feed, f32 accumulate.
            h = jnp.dot(h, w_ref[...], preferred_element_type=jnp.float32)
            if i < num_weights - 1:
                h = jnp.maximum(h, 0.0).astype(jnp.bfloat16)   # fused ReLU
        o_ref[...] = h.astype(o_ref.dtype)               # lane-dense f32 store

    return kernel


def mlp_block_forward(x, weights, *, tile_m=256, lane=128):
    """Pallas forward of MLP_block.

    Args:
      x: (N, in_dim) float32.
      weights: PyTorch-layout weight matrices, each (out_features, in_features):
        [(hidden, in)] + [(hidden, hidden)] * (layers - 2) + [(out, hidden)],
        or a single (out, in) matrix when layers == 1.
    Returns:
      (N, out_dim) float32.
    """
    n, in_dim = x.shape
    out_dim = weights[-1].shape[0]
    num_w = len(weights)

    # Feature-dim chain  in -> hidden -> ... -> out, padded to lane multiples
    # so every matmul K/N and the output store are 128-lane dense.
    dims = [in_dim] + [w.shape[0] for w in weights]
    pdims = [_round_up(d, lane) for d in dims]

    # Pre-transpose to (in, out), zero-pad, cast to bf16 -- once, in the wrapper
    # (pure layout plumbing; padding columns/rows are zeros so results match).
    wts = []
    for w, di, do in zip(weights, pdims[:-1], pdims[1:]):
        wt = jnp.transpose(w)                             # (in, out)
        wt = jnp.pad(wt, ((0, di - wt.shape[0]), (0, do - wt.shape[1])))
        wts.append(wt.astype(jnp.bfloat16))

    # Batch tile: sublane-aligned, never larger than the (padded) batch, and
    # kept to >= 2 grid steps when possible so both v7x TensorCores get work.
    n_sub = _round_up(n, 8)
    tm = _round_up(min(tile_m, n_sub), 8)
    if n_sub >= 16 and n_sub < 2 * tm:
        tm = _round_up(pl.cdiv(n_sub, 2), 8)
    n_pad = _round_up(n_sub, tm)
    grid = (n_pad // tm,)

    # Pad batch + feature dim of x once in the wrapper; cast to bf16 (halves
    # HBM traffic for the activations).
    xp = jnp.pad(x, ((0, n_pad - n), (0, pdims[0] - in_dim))).astype(jnp.bfloat16)

    in_specs = [pl.BlockSpec((tm, pdims[0]), lambda i: (i, 0))]
    for wt in wts:
        # Grid-invariant block (constant index_map): Pallas does not re-fetch
        # it across grid steps.  For very large hidden dims the weights should
        # instead be K-tiled with a reduction grid axis + f32 accumulator.
        in_specs.append(pl.BlockSpec(wt.shape, lambda i: (0, 0)))
    out_spec = pl.BlockSpec((tm, pdims[-1]), lambda i: (i, 0))

    # Explicit VMEM budget: x/out tiles double-buffered + resident weights,
    # 2x headroom, floored at the 32 MiB scoped default and capped below the
    # 64 MiB physical VMEM of a v7x TensorCore.
    vmem_bytes = 2 * tm * pdims[0] * 2 + 2 * tm * pdims[-1] * 4
    vmem_bytes += sum(2 * int(wt.size) * 2 for wt in wts)
    vmem_limit = int(min(max(2 * vmem_bytes + (8 << 20), 32 << 20), 60 << 20))

    out = pl.pallas_call(
        make_mlp_kernel(num_w),
        out_shape=jax.ShapeDtypeStruct((n_pad, pdims[-1]), jnp.float32),
        grid=grid,
        in_specs=in_specs,
        out_specs=out_spec,
        compiler_params=pltpu.CompilerParams(
            dimension_semantics=("parallel",),
            vmem_limit_bytes=vmem_limit,
        ),
    )(xp, *wts)

    return out[:n, :out_dim]


def init_mlp_weights(key, in_dim, out_dim, hidden_dim, layers):
    """Deterministic synthetic weights matching MLP_block.__init__ shapes."""
    if layers == 1:
        # PyTorch module zero-inits this case.
        return [jnp.zeros((out_dim, in_dim), jnp.float32)]
    keys = jax.random.split(key, layers)
    ws = [0.1 * jax.random.normal(keys[0], (hidden_dim, in_dim), jnp.float32)]
    for l in range(layers - 2):
        ws.append(
            0.1 * jax.random.normal(keys[l + 1], (hidden_dim, hidden_dim), jnp.float32)
        )
    ws.append(0.1 * jax.random.normal(keys[-1], (out_dim, hidden_dim), jnp.float32))
    return ws


def mlp_reference(x, weights):
    """Pure-JAX f32 reference mirroring the PyTorch forward."""
    h = x
    for i, w in enumerate(weights):
        h = h @ w.T
        if i < len(weights) - 1:
            h = jnp.maximum(h, 0.0)
    return h


if __name__ == "__main__":
    # MLP_block(in_dim=16, out_dim=8, hidden_dim=32, layers=3) applied to a
    # (256, 16) batch -> grid of 2 batch tiles of 128 rows each.
    in_dim, out_dim, hidden_dim, layers = 16, 8, 32, 3
    batch = 256

    key = jax.random.PRNGKey(0)
    kx, kw = jax.random.split(key)
    x = jax.random.normal(kx, (batch, in_dim), jnp.float32)
    weights = init_mlp_weights(kw, in_dim, out_dim, hidden_dim, layers)

    out = mlp_block_forward(x, weights)
    out = jax.block_until_ready(out)

    ref = mlp_reference(x, weights)
    assert out.shape == (batch, out_dim)
    # bf16 matmul operands with f32 accumulation -> relaxed tolerance vs f32 ref.
    assert jnp.allclose(out, ref, atol=2e-2, rtol=2e-2), "mismatch vs reference"

    print("KERNEL_OK")
</pallas_src>

<mosaic_0001>
module attributes {stable_mosaic.version = 11 : i64} {
  func.func @kernel(%arg0: i32, %arg1: memref<128x128xbf16, #tpu.memory_space<vmem>>, %arg2: memref<128x128xbf16, #tpu.memory_space<vmem>>, %arg3: memref<128x128xbf16, #tpu.memory_space<vmem>>, %arg4: memref<128x128xbf16, #tpu.memory_space<vmem>>, %arg5: memref<128x128xf32, #tpu.memory_space<vmem>>) attributes {dimension_semantics = [#tpu.dimension_semantics<parallel>], iteration_bounds = array<i64: 2>, scalar_prefetch = 0 : i64, scratch_operands = 0 : i64, tpu.core_type = #tpu.core_type<tc>, window_params = [{transform_indices = @transform_0, window_bounds = array<i64: 128, 128>}, {pipeline_mode = #tpu.pipeline_mode<synchronous>, transform_indices = @transform_1, window_bounds = array<i64: 128, 128>}, {pipeline_mode = #tpu.pipeline_mode<synchronous>, transform_indices = @transform_2, window_bounds = array<i64: 128, 128>}, {pipeline_mode = #tpu.pipeline_mode<synchronous>, transform_indices = @transform_3, window_bounds = array<i64: 128, 128>}, {transform_indices = @transform_4, window_bounds = array<i64: 128, 128>}]} {
    %c0 = arith.constant 0 : index
    %c0_0 = arith.constant 0 : index
    %0 = vector.load %arg1[%c0, %c0_0] : memref<128x128xbf16, #tpu.memory_space<vmem>>, vector<128x128xbf16>
    %c0_1 = arith.constant 0 : index
    %c0_2 = arith.constant 0 : index
    %1 = vector.load %arg2[%c0_1, %c0_2] : memref<128x128xbf16, #tpu.memory_space<vmem>>, vector<128x128xbf16>
    %cst = arith.constant dense<0.000000e+00> : vector<128x128xf32>
    %2 = tpu.matmul %0, %1, %cst {dimension_numbers = #tpu.dot_dimension_numbers<[1], [0], [0], [1], [0, 0, 1, 1], [], []>} : vector<128x128xbf16>, vector<128x128xbf16>, vector<128x128xf32> -> vector<128x128xf32>
    %cst_3 = arith.constant 0.000000e+00 : f32
    %3 = vector.broadcast %cst_3 : f32 to vector<128x128xf32>
    %4 = arith.maximumf %2, %3 : vector<128x128xf32>
    %5 = arith.truncf %4 : vector<128x128xf32> to vector<128x128xbf16>
    %c0_4 = arith.constant 0 : index
    %c0_5 = arith.constant 0 : index
    %6 = vector.load %arg3[%c0_4, %c0_5] : memref<128x128xbf16, #tpu.memory_space<vmem>>, vector<128x128xbf16>
    %cst_6 = arith.constant dense<0.000000e+00> : vector<128x128xf32>
    %7 = tpu.matmul %5, %6, %cst_6 {dimension_numbers = #tpu.dot_dimension_numbers<[1], [0], [0], [1], [0, 0, 1, 1], [], []>} : vector<128x128xbf16>, vector<128x128xbf16>, vector<128x128xf32> -> vector<128x128xf32>
    %cst_7 = arith.constant 0.000000e+00 : f32
    %8 = vector.broadcast %cst_7 : f32 to vector<128x128xf32>
    %9 = arith.maximumf %7, %8 : vector<128x128xf32>
    %10 = arith.truncf %9 : vector<128x128xf32> to vector<128x128xbf16>
    %c0_8 = arith.constant 0 : index
    %c0_9 = arith.constant 0 : index
    %11 = vector.load %arg4[%c0_8, %c0_9] : memref<128x128xbf16, #tpu.memory_space<vmem>>, vector<128x128xbf16>
    %cst_10 = arith.constant dense<0.000000e+00> : vector<128x128xf32>
    %12 = tpu.matmul %10, %11, %cst_10 {dimension_numbers = #tpu.dot_dimension_numbers<[1], [0], [0], [1], [0, 0, 1, 1], [], []>} : vector<128x128xbf16>, vector<128x128xbf16>, vector<128x128xf32> -> vector<128x128xf32>
    %c0_11 = arith.constant 0 : index
    %c0_12 = arith.constant 0 : index
    %13 = vector.load %arg5[%c0_11, %c0_12] : memref<128x128xf32, #tpu.memory_space<vmem>>, vector<128x128xf32>
    tpu.vector_store %arg5[%c0_11, %c0_12], %12 {strides = array<i32>} : memref<128x128xf32, #tpu.memory_space<vmem>>, vector<128x128xf32>,
    return
  }
  func.func @transform_0(%arg0: i32) -> (i32, i32) {
    %c0_i32 = arith.constant 0 : i32
    %c0_i32_0 = arith.constant 0 : i32
    return %arg0, %c0_i32 : i32, i32
  }
  func.func @transform_1(%arg0: i32) -> (i32, i32) {
    %c0_i32 = arith.constant 0 : i32
    %c0_i32_0 = arith.constant 0 : i32
    %c0_i32_1 = arith.constant 0 : i32
    return %c0_i32, %c0_i32_0 : i32, i32
  }
  func.func @transform_2(%arg0: i32) -> (i32, i32) {
    %c0_i32 = arith.constant 0 : i32
    %c0_i32_0 = arith.constant 0 : i32
    %c0_i32_1 = arith.constant 0 : i32
    return %c0_i32, %c0_i32_0 : i32, i32
  }
  func.func @transform_3(%arg0: i32) -> (i32, i32) {
    %c0_i32 = arith.constant 0 : i32
    %c0_i32_0 = arith.constant 0 : i32
    %c0_i32_1 = arith.constant 0 : i32
    return %c0_i32, %c0_i32_0 : i32, i32
  }
  func.func @transform_4(%arg0: i32) -> (i32, i32) {
    %c0_i32 = arith.constant 0 : i32
    %c0_i32_0 = arith.constant 0 : i32
    return %arg0, %c0_i32 : i32, i32
  }
}

</mosaic_0001>

<bundles_post_ra>
// kernel: tpu_custom_call.1
= control target key start
LH: loop header
LB: loop body
LE: loop exit
PB: predicated region body
PF: predicated region fallthrough
CT: control target
= control target key end

     0   :  { %9 = vsyncpa [#allocation3], 0  ;;  %s1773_s0 = inlined_call_operand.hbm [shape: bf16[256,128], index: 0, kind: input, shape index: {}]   ;;  %s1774_s1 = inlined_call_operand.hbm [shape: bf16[128,128], index: 1, kind: input, shape index: {}]   ;;  %s1775_s2 = inlined_call_operand.hbm [shape: bf16[128,128], index: 2, kind: input, shape index: {}]   ;;  %s1776_s3 = inlined_call_operand.hbm [shape: bf16[128,128], index: 3, kind: input, shape index: {}]   ;;  %s1777_s4 = inlined_call_operand.hbm [shape: f32[256,128], index: 4, kind: output, shape index: {}]  }
   0x1   :  { %11 = vsyncpa [#allocation3 + $0x1], 0 }
   0x2   :  { %12 = vsyncpa [#allocation6], 0 }
   0x3   :  { %13 = vsyncpa [#allocation9], 0 }
   0x4   :  { %14 = vsyncpa [#allocation4], 0 }
   0x5   :  { %16 = vsyncpa [#allocation4 + $0x1], 0  ;;  %s1531_s15 = smov 0   ;;  %s1533_s16 = smov 0  }
   0x6   :  { %s1535_s17 = smov 0   ;;  %s1537_s18 = smov 0  }
   0x7 LB: > { %s1552_s19 = sadd.s32 4294967295, %s1495_s18   ;;  %s990_s20 = sadd.s32 4294967294, %s1495_s18   ;;  %s1495_s18 = sphi %s1537_s18, %s1800_s18   ;;  %s1491_s17 = sphi %s1535_s17, %s1799_s17   ;;  %s1487_s16 = sphi %s1533_s16, %s1798_s16   ;;  %s1483_s15 = sphi %s1531_s15, %s1797_s15  }
   0x8   : > { %p42_p0 = scmp.ne.s32.totalorder %s1487_s16, %s1483_s15  ;;  %p1778_p1 = scmp.eq.s32.totalorder %s1552_s19, 0 }
   0x9   : > { %p129_p2 = scmp.eq.s32.totalorder %s1552_s19, 1  ;;  %p135_p3 = scmp.eq.s32.totalorder %s990_s20, 1 }
   0xa   : > { %p1561_p4 = por %p1778_p1, %p42_p0  ;;  %p991_p5 = scmp.ge.s32.totalorder %s1495_s18, 1 }
   0xb   : > { %p1566_p6 = por %p135_p3, %p42_p0  ;;  %p142_p7 = scmp.lt.s32.totalorder %s1495_s18, 3 }
   0xc   : > { %s1782_s21 = scalar_select %p1561_p4, 1, 0 }
   0xd   : > { %s1783_s22 = scalar_select %p1566_p6, 1, 0 }
   0xe   : > { %p1571_p8 = pnand %p991_p5, %p142_p7  ;;  %s1497_s24 = smov [#allocation5]  }
   0xf   : > { %s154_s25 = sshll.u32 %s1497_s24, 4  ;;  %s1498_s27 = smov [#allocation7]   ;;  %s155_s25 = int_to_ptr.vmem [resolvable:$true] %s154_s25 }
  0x10   : > { %s1784_s23 = scalar_select %p1571_p8, 1, 0 }
  0x11   : > { %p1220_p9 = pneg %p1571_p8  ;;  %s167_s28 = sshll.u32 %s1498_s27, 4  ;;  %s168_s28 = int_to_ptr.vmem [resolvable:$true] %s167_s28 }
  0x12   : > { %s1499_s29 = smov [#allocation8]   ;;  %s1328_s5 = scalar_lea.vmem %s155_s25, 1024 }
  0x13   : > { %p1580_p11 = pnand %p1220_p9, %p1778_p1  ;;  %s180_s30 = sshll.u32 %s1499_s29, 4  ;;  %s181_s30 = int_to_ptr.vmem [resolvable:$true] %s180_s30 }
  0x14   : > { %p1329_p13 = scmp.ne.s32.totalorder %s155_s25, %s1328_s5  ;;  %p1336_p5 = scmp.lt.s32.totalorder %s155_s25, %s155_s25 }
  0x15   : > { %p1319_p12 = pneg %p1580_p11  ;;  %p1337_p7 = scmp.lt.s32.totalorder %s1328_s5, %s1328_s5 }
  0x17   : > { %p1331_p0 = pnand %p1329_p13, %p1319_p12  ;;  %p1338_p9 = por %p1337_p7, %p1336_p5 }
  0x19   : > { %p1332_p3 = pneg %p1331_p0 }
  0x1b   : > { %p1339_p10 = pnand %p1338_p9, %p1332_p3 }
  0x1d   : > { %1342 = shalt.err (!%p1339_p10)
}
  0x1e   : > { %s1500_s6 = smov 64   ;;  %s1501_s7 = smov 4  }
  0x1f   : > { %1223 = dma.hbm_to_vmem [thread:$0]  (!%p1580_p11), %s1774_s1, 1024, %s155_s25, [#allocation6], %s1500_s6, %s1500_s6, %s1501_s7  }
  0x20   : > { %s1354_s10 = scalar_lea.vmem %s168_s28, 1024  ;;  %p1362_p3 = scmp.lt.s32.totalorder %s168_s28, %s168_s28 }
  0x21   : > { %p1355_p13 = scmp.ne.s32.totalorder %s168_s28, %s1354_s10  ;;  %p1363_p10 = scmp.lt.s32.totalorder %s1354_s10, %s1354_s10 }
  0x23   : > { %p1357_p0 = pnand %p1355_p13, %p1319_p12  ;;  %p1364_p7 = por %p1363_p10, %p1362_p3 }
  0x25   : > { %p1358_p5 = pneg %p1357_p0 }
  0x27   : > { %p1365_p9 = pnand %p1364_p7, %p1358_p5 }
  0x29   : > { %1368 = shalt.err (!%p1365_p9)
}
  0x2a   : > { %1226 = dma.hbm_to_vmem [thread:$0]  (!%p1580_p11), %s1775_s2, 1024, %s168_s28, [#allocation6], %s1500_s6, %s1500_s6, %s1501_s7  }
  0x2b   : > { %s1380_s13 = scalar_lea.vmem %s181_s30, 1024  ;;  %p1388_p3 = scmp.lt.s32.totalorder %s181_s30, %s181_s30 }
  0x2c   : > { %p1381_p1 = scmp.ne.s32.totalorder %s181_s30, %s1380_s13  ;;  %p1389_p5 = scmp.lt.s32.totalorder %s1380_s13, %s1380_s13 }
  0x2e   : > { %p1383_p13 = pnand %p1381_p1, %p1319_p12  ;;  %p1390_p10 = por %p1389_p5, %p1388_p3 }
  0x30   : > { %p1384_p0 = pneg %p1383_p13 }
  0x32   : > { %p1391_p7 = pnand %p1390_p10, %p1384_p0 }
  0x34   : > { %1394 = shalt.err (!%p1391_p7)
}
  0x35   : > { %1229 = dma.hbm_to_vmem [thread:$0]  (!%p1580_p11), %s1776_s3, 1024, %s181_s30, [#allocation9], %s1500_s6, %s1500_s6, %s1501_s7  }
  0x36   : > { %s1620_s24 = sadd.s32 1, %s1495_s18   ;;  %s29_s26 = sadd.s32 1, %s1491_s17 }
  0x37   : > { %s26_s25 = ssub.s32 %s1495_s18, %s1620_s24  ;;  %p36_p12 = scmp.ne.s32.totalorder %s1491_s17, %s1487_s16 }
  0x38   : > { %p27_p1 = scmp.eq.s32.totalorder %s26_s25, 0  ;;  %p37_p9 = scmp.eq.s32.totalorder %s1495_s18, 0 }
  0x39   : > { %p1241_p13 = scmp.lt.s32.totalorder %s1495_s18, 2  ;;  %p1634_p3 = por %p129_p2, %p36_p12 }
  0x3a   : > { %s1630_s27 = scalar_select %p27_p1, %s1491_s17, %s29_s26  }
  0x3b   : > { %p38_p0 = por %p37_p9, %p36_p12  ;;  %s194_s29 = sand.u32 1, %s1491_s17  }
  0x3c   : > { %s1786_s28 = scalar_select %p1634_p3, 1, 0 }
  0x3d   : > { %s1042_s5 = sshll.u32 %s1495_s18, 10  ;;  %s996_s30 = sshll.u32 %s194_s29, 6 }
  0x3e   : > { %s1643_s10 = scalar_lea.hbm %s1773_s0, %s1042_s5  ;;  %s198_s11 = scalar_lea.vmem [#allocation2], %s996_s30 }
  0x3f   : > { %s205_s12 = sshll.u32 %s198_s11, 4  ;;  %p1645_p11 = pnand %p1241_p13, %p38_p0  ;;  %s1649_s12 = int_to_ptr.vmem [resolvable:$true] %s205_s12 }
  0x40   : > { %s1651_s14 = scalar_lea.sflag [#allocation3], %s194_s29  ;;  %s1395_s20 = scalar_lea.hbm %s1643_s10, 1024 }
  0x41   : > { %p1396_p2 = scmp.ne.s32.totalorder %s1643_s10, %s1395_s20  ;;  %p1397_p5 = pneg %p1645_p11 }
  0x42   : > { %s1400_s5 = scalar_lea.hbm %s1773_s0, 2048  ;;  %p1401_p1 = scmp.lt.s32.totalorder %s1643_s10, %s1773_s0 }
  0x43   : > { %p1398_p10 = pnand %p1397_p5, %p1396_p2  ;;  %p1402_p12 = scmp.lt.s32.totalorder %s1400_s5, %s1395_s20 }
  0x45   : > { %p1399_p7 = pneg %p1398_p10  ;;  %p1403_p9 = por %p1402_p12, %p1401_p1 }
  0x47   : > { %p1404_p13 = pnand %p1403_p9, %p1399_p7 }
  0x49   : > { %1407 = shalt.err (!%p1404_p13)
}
  0x4a   : > { %s1408_s29 = scalar_lea.vmem %s1649_s12, 1024  ;;  %s1502_s9 = smov [#allocation2]  }
  0x4b   : > { %p1409_p0 = scmp.ne.s32.totalorder %s1649_s12, %s1408_s29  ;;  %s1413_s11 = sshll.u32 %s1502_s9, 4  ;;  %s1414_s11 = int_to_ptr.vmem [resolvable:$false] %s1413_s11 }
  0x4c   : > { %s1415_s25 = scalar_lea.vmem %s1414_s11, 2048  ;;  %p1416_p10 = scmp.lt.s32.totalorder %s1649_s12, %s1414_s11 }
  0x4d   : > { %p1411_p6 = pnand %p1409_p0, %p1397_p5  ;;  %p1417_p3 = scmp.lt.s32.totalorder %s1415_s25, %s1408_s29 }
  0x4f   : > { %p1412_p2 = pneg %p1411_p6  ;;  %p1418_p4 = por %p1417_p3, %p1416_p10 }
  0x51   : > { %p1419_p8 = pnand %p1418_p4, %p1412_p2 }
  0x53   : > { %1422 = shalt.err (!%p1419_p8)
}
  0x54   : > { %1233 = dma.hbm_to_vmem [thread:$0]  (!%p1645_p11), %s1643_s10, 1024, %s1649_s12, %s1651_s14, %s1500_s6, %s1500_s6, %s1501_s7  }
  0x55   : > { %p1788_p6 = scmp.ne.s32.totalorder %s1784_s23, 0 }
  0x56   : > { %s1678_s20 = sand.u32 (!%p1788_p6), 1, %s1487_s16   ;;  %p1789_p4 = scmp.ne.s32.totalorder (!%p1788_p6), %s1782_s21, 0 }
  0x57   : > { %217 = sbr.rel (%p1788_p6) target bundleno = 778 (0x30a), region = 36  ;;  %s1000_s26 = sshll.u32 (!%p1788_p6), %s1678_s20, 6 }
  0x58   : > { %s220_s5 = scalar_lea.sflag (!%p1788_p6), [#allocation3], %s1678_s20  ;;  %s1682_s30 = scalar_lea.vmem (!%p1788_p6), [#allocation2], %s1000_s26 }
  0x5c   : > { %1466 = dma.done.wait (%p1789_p4), %s220_s5, 1024  }
  0x5d   : > { %1468 = vsyncadd (%p1789_p4), %s220_s5, 4294966272  ;;  %p1790_p8 = scmp.eq.s32.totalorder %s1552_s19, 0 }
  0x5f   : > { %1470 = dma.done.wait (%p1790_p8), [#allocation6], 2048   ;;  %p1791_p3 = pmov %p1790_p8 }
  0x61   : > { %1472 = vsyncadd (%p1791_p3), [#allocation6], 4294965248  ;;  %p1792_p11 = pmov %p1791_p3 }
  0x62   : > { %p1793_p5 = pmov %p1791_p3 }
  0x63   : > { %1474 = dma.done.wait (%p1792_p11), [#allocation9], 1024  }
  0x64   : > { %1476 = vsyncadd (%p1793_p5), [#allocation9], 4294966272  ;;  %v1285_v0 = vld [vmem:[#allocation5 + $0x38] sm:$0xff]   ;;  %v1286_v1 = vld [vmem:[#allocation5 + $0x30] sm:$0xff]   ;;  %s1004_s21 = sshll.u32 %s1678_s20, 7  ;;  %s1043_s6 = sshll.u32 %s1552_s19, 11 }
  0x65   : > { %1092 = vmatprep.subr.bf16.mxu0 %v1285_v0  ;;  %v1287_v2 = vld [vmem:[#allocation5 + $0x28] sm:$0xff]   ;;  %v1288_v3 = vld [vmem:[#allocation5 + $0x20] sm:$0xff]   ;;  %v1289_v5 = vld [vmem:[#allocation5 + $0x18] sm:$0xff]   ;;  %s1705_s23 = scalar_lea.vmem [#allocation10], %s1004_s21  ;;  %s1726_s13 = scalar_lea.hbm %s1777_s4, %s1043_s6 }
  0x66   : > { %1093 = vmatpush3.bf16.msra.mxu0 %v1285_v0  ;;  %v1293_v4 = vld [vmem:[%s1682_s30] sm:$0xff]   ;;  %v1290_v6 = vld [vmem:[#allocation5 + $0x10] sm:$0xff]   ;;  %v1301_v7 = vld [vmem:[#allocation7 + $0x38] sm:$0xff]   ;;  %s888_s7 = sshll.u32 %s1705_s23, 4  ;;  %s875_s14 = scalar_lea.sflag [#allocation4], %s1678_s20  ;;  %s1728_s7 = int_to_ptr.vmem [resolvable:$true] %s888_s7 }
  0x67   : > { %1094 = vmatprep.subr.bf16.mxu0 %v1286_v1  ;;  %1108 = vmatprep.mubr.bf16.mxu0 %v1293_v4  ;;  %v1302_v8 = vld [vmem:[#allocation7 + $0x30] sm:$0xff]   ;;  %v1291_v9 = vld [vmem:[#allocation5 + $0x8] sm:$0xff]   ;;  %v1292_v11 = vld [vmem:[#allocation5] sm:$0xff]   ;;  %s1423_s8 = scalar_lea.vmem %s1728_s7, 2048  ;;  %p1794_p1 = scmp.ne.s32.totalorder %s1786_s28, 0 }
  0x68   : > { %1124 = vmatprep.subr.bf16.mxu1 %v1301_v7  ;;  %v1303_v10 = vld [vmem:[#allocation7 + $0x28] sm:$0xff]   ;;  %v1304_v12 = vld [vmem:[#allocation7 + $0x20] sm:$0xff]   ;;  %v1305_v13 = vld [vmem:[#allocation7 + $0x18] sm:$0xff]   ;;  %p1424_p7 = scmp.ne.s32.totalorder %s1728_s7, %s1423_s8  ;;  %s1503_s19 = smov [#allocation10]  }
  0x69   : > { %1125 = vmatpush3.bf16.msra.mxu1 %v1301_v7  ;;  %v1294_v14 = vld [vmem:[%s1682_s30 + $0x8] sm:$0xff]   ;;  %v1295_v15 = vld [vmem:[%s1682_s30 + $0x10] sm:$0xff]   ;;  %v1296_v16 = vld [vmem:[%s1682_s30 + $0x18] sm:$0xff]   ;;  %s1427_s29 = sshll.u32 %s1503_s19, 4  ;;  %s1428_s29 = int_to_ptr.vmem [resolvable:$false] %s1427_s29 }
  0x6a   : > { %1095 = vmatpush3.bf16.msra.mxu0 %v1286_v1  ;;  %1126 = vmatprep.subr.bf16.mxu1 %v1302_v8  ;;  %v1297_v17 = vld [vmem:[%s1682_s30 + $0x20] sm:$0xff]   ;;  %v1298_v18 = vld [vmem:[%s1682_s30 + $0x28] sm:$0xff]   ;;  %v1299_v19 = vld [vmem:[%s1682_s30 + $0x30] sm:$0xff]   ;;  %p1425_p12 = pnand %p1424_p7, %p1794_p1  ;;  %s1429_s9 = scalar_lea.vmem %s1428_s29, 4096 }
  0x6b   : > { %1096 = vmatprep.subr.bf16.mxu0 %v1287_v2  ;;  %v1300_v20 = vld [vmem:[%s1682_s30 + $0x38] sm:$0xff]   ;;  %v1306_v21 = vld [vmem:[#allocation7 + $0x10] sm:$0xff]   ;;  %v1307_v22 = vld [vmem:[#allocation7 + $0x8] sm:$0xff]   ;;  %p1430_p13 = scmp.lt.s32.totalorder %s1728_s7, %s1428_s29  ;;  %p1431_p0 = scmp.lt.s32.totalorder %s1429_s9, %s1423_s8 }
  0x6c   : > { %v1308_v23 = vld [vmem:[#allocation7] sm:$0xff]   ;;  %v1309_v24 = vld [vmem:[#allocation8 + $0x38] sm:$0xff]   ;;  %v1310_v25 = vld [vmem:[#allocation8 + $0x30] sm:$0xff]   ;;  %p1426_p9 = pneg %p1425_p12 }
  0x6d   : > { %1127 = vmatpush3.bf16.msra.mxu1 %v1302_v8  ;;  %v1311_v26 = vld [vmem:[#allocation8 + $0x28] sm:$0xff]   ;;  %v1312_v27 = vld [vmem:[#allocation8 + $0x20] sm:$0xff]   ;;  %v1313_v28 = vld [vmem:[#allocation8 + $0x18] sm:$0xff]   ;;  %p1432_p2 = por %p1431_p0, %p1430_p13 }
  0x6e   : > { %1097 = vmatpush3.bf16.msra.mxu0 %v1287_v2  ;;  %1128 = vmatprep.subr.bf16.mxu1 %v1303_v10  ;;  %v1316_v7 = vld [vmem:[#allocation8] sm:$0xff]  }
  0x6f   : > { %1098 = vmatprep.subr.bf16.mxu0 %v1288_v3  ;;  %p1433_p10 = pnand %p1432_p2, %p1426_p9 }
  0x71   : > { %1129 = vmatpush3.bf16.msra.mxu1 %v1303_v10 }
  0x72   : > { %1099 = vmatpush3.bf16.msra.mxu0 %v1288_v3  ;;  %1130 = vmatprep.subr.bf16.mxu1 %v1304_v12 }
  0x73   : > { %1100 = vmatprep.subr.bf16.mxu0 %v1289_v5 }
  0x75   : > { %1131 = vmatpush3.bf16.msra.mxu1 %v1304_v12 }
  0x76   : > { %1101 = vmatpush3.bf16.msra.mxu0 %v1289_v5  ;;  %1132 = vmatprep.subr.bf16.mxu1 %v1305_v13  ;;  %v1314_v5 = vld [vmem:[#allocation8 + $0x10] sm:$0xff]  }
  0x77   : > { %1102 = vmatprep.subr.bf16.mxu0 %v1290_v6 }
  0x79   : > { %1133 = vmatpush3.bf16.msra.mxu1 %v1305_v13 }
  0x7a   : > { %1103 = vmatpush3.bf16.msra.mxu0 %v1290_v6  ;;  %1134 = vmatprep.subr.bf16.mxu1 %v1306_v21  ;;  %v1315_v6 = vld [vmem:[#allocation8 + $0x8] sm:$0xff]  }
  0x7b   : > { %1104 = vmatprep.subr.bf16.mxu0 %v1291_v9 }
  0x7d   : > { %1135 = vmatpush3.bf16.msra.mxu1 %v1306_v21 }
  0x7e   : > { %1105 = vmatpush3.bf16.msra.mxu0 %v1291_v9  ;;  %1136 = vmatprep.subr.bf16.mxu1 %v1307_v22 }
  0x7f   : > { %1106 = vmatprep.subr.bf16.mxu0 %v1292_v11 }
  0x81   : > { %1137 = vmatpush3.bf16.msra.mxu1 %v1307_v22 }
  0x82   : > { %1107 = vmatpush3.bf16.msra.mxu0 %v1292_v11  ;;  %1138 = vmatprep.subr.bf16.mxu1 %v1308_v23 }
  0x83   : > { %1156 = vmatprep.subr.bf16.mxu0 %v1309_v24 }
  0x85   : > { %1109 = vmatmul.mubr.bf16.vlgmr.msra.gmra.mxu0 %v1294_v14  ;;  %1139 = vmatpush3.bf16.msra.mxu1 %v1308_v23 }
  0x86   : > { %1112 = vmatprep.mubr.bf16.mxu0 %v1295_v15  ;;  %1188 = vmatprep.subr.bf16.mxu1 %v1309_v24 }
  0x87   : > { %1157 = vmatpush3.bf16.msra.mxu0 %v1309_v24 }
  0x88   : > { %1158 = vmatprep.subr.bf16.mxu0 %v1310_v25 }
  0x8b   : > { %1159 = vmatpush3.bf16.msra.mxu0 %v1310_v25 }
  0x8c   : > { %1160 = vmatprep.subr.bf16.mxu0 %v1311_v26 }
  0x8d   : > { %1113 = vmatmul.mubr.bf16.gmra.mxu0 %v1296_v16 }
  0x8e   : > { %1116 = vmatprep.mubr.bf16.mxu0 %v1297_v17 }
  0x8f   : > { %1161 = vmatpush3.bf16.msra.mxu0 %v1311_v26 }
  0x90   : > { %1162 = vmatprep.subr.bf16.mxu0 %v1312_v27 }
  0x93   : > { %1163 = vmatpush3.bf16.msra.mxu0 %v1312_v27 }
  0x94   : > { %1164 = vmatprep.subr.bf16.mxu0 %v1313_v28 }
  0x95   : > { %1117 = vmatmul.mubr.bf16.gmra.mxu0 %v1298_v18 }
  0x96   : > { %1120 = vmatprep.mubr.bf16.mxu0 %v1299_v19 }
  0x97   : > { %1165 = vmatpush3.bf16.msra.mxu0 %v1313_v28 }
  0x98   : > { %1166 = vmatprep.subr.bf16.mxu0 %v1314_v5 }
  0x9b   : > { %1167 = vmatpush3.bf16.msra.mxu0 %v1314_v5 }
  0x9c   : > { %1168 = vmatprep.subr.bf16.mxu0 %v1315_v6 }
  0x9d   : > { %1121 = vmatmul.mubr.bf16.gmra.mxu0 %v1300_v20 }
  0x9f   : > { %1169 = vmatpush3.bf16.msra.mxu0 %v1315_v6 }
  0xa0   : > { %1170 = vmatprep.subr.bf16.mxu0 %v1316_v7 }
  0xa3   : > { %1171 = vmatpush3.bf16.msra.mxu0 %v1316_v7 }
 0x145   : > { %v1110_v29 = vpop.f32.mrf.mxu0 }
 0x146   : > { %v490_v36 = vmax.f32 %v1110_v29, 0.0 }
 0x147   : > { %v425_v30 = vpop.f32.mrf.mxu0 }
 0x148   : > { %v488_v34 = vmax.f32 %v425_v30, 0.0 }
 0x149   : > { %v1111_v31 = vpop.f32.mrf.mxu0 }
 0x14a   : > { %v491_v32 = vmax.f32 %v1111_v31, 0.0 }
 0x14b   : > { %v428_v33 = vpop.f32.mrf.mxu0 }
 0x14c   : > { %v489_v35 = vmax.f32 %v428_v33, 0.0  ;;  %v505_v39 = vpack.c.bf16 %v491_v32, %v490_v36 }
 0x14d   : > { %v1114_v37 = vpop.f32.mrf.mxu0 }
 0x14e   : > { %v504_v38 = vpack.c.bf16 %v489_v35, %v488_v34  ;;  %v494_v46 = vmax.f32 %v1114_v37, 0.0 }
 0x14f   : > { %v441_v40 = vpop.f32.mrf.mxu0 }
 0x150   : > { %1140 = vmatprep.mubr.bf16.mxu1 %v504_v38  ;;  %v492_v44 = vmax.f32 %v441_v40, 0.0 }
 0x151   : > { %v1115_v41 = vpop.f32.mrf.mxu0  ;;  %1141 = vmatmul.mubr.bf16.vlgmr.msra.gmra.mxu1 %v505_v39 }
 0x152   : > { %1196 = vmatpush3.bf16.msra.mxu1 %v1309_v24  ;;  %v495_v42 = vmax.f32 %v1115_v41, 0.0 }
 0x153   : > { %v444_v43 = vpop.f32.mrf.mxu0  ;;  %1189 = vmatprep.subr.bf16.mxu1 %v1310_v25 }
 0x154   : > { %v493_v45 = vmax.f32 %v444_v43, 0.0  ;;  %v507_v49 = vpack.c.bf16 %v495_v42, %v494_v46 }
 0x155   : > { %v1118_v47 = vpop.f32.mrf.mxu0 }
 0x156   : > { %v506_v48 = vpack.c.bf16 %v493_v45, %v492_v44  ;;  %1197 = vmatpush3.bf16.msra.mxu1 %v1310_v25  ;;  %v498_v56 = vmax.f32 %v1118_v47, 0.0 }
 0x157   : > { %v457_v50 = vpop.f32.mrf.mxu0  ;;  %1190 = vmatprep.subr.bf16.mxu1 %v1311_v26 }
 0x158   : > { %1144 = vmatprep.mubr.bf16.mxu1 %v506_v48  ;;  %v496_v54 = vmax.f32 %v457_v50, 0.0 }
 0x159   : > { %v1119_v51 = vpop.f32.mrf.mxu0  ;;  %1145 = vmatmul.mubr.bf16.gmra.mxu1 %v507_v49 }
 0x15a   : > { %1198 = vmatpush3.bf16.msra.mxu1 %v1311_v26  ;;  %v499_v52 = vmax.f32 %v1119_v51, 0.0 }
 0x15b   : > { %v460_v53 = vpop.f32.mrf.mxu0  ;;  %1191 = vmatprep.subr.bf16.mxu1 %v1312_v27 }
 0x15c   : > { %v497_v55 = vmax.f32 %v460_v53, 0.0  ;;  %v509_v59 = vpack.c.bf16 %v499_v52, %v498_v56 }
 0x15d   : > { %v1122_v57 = vpop.f32.mrf.mxu0 }
 0x15e   : > { %v508_v58 = vpack.c.bf16 %v497_v55, %v496_v54  ;;  %1199 = vmatpush3.bf16.msra.mxu1 %v1312_v27  ;;  %v502_v2 = vmax.f32 %v1122_v57, 0.0 }
 0x15f   : > { %v473_v60 = vpop.f32.mrf.mxu0  ;;  %1192 = vmatprep.subr.bf16.mxu1 %v1313_v28 }
 0x160   : > { %1148 = vmatprep.mubr.bf16.mxu1 %v508_v58  ;;  %v500_v0 = vmax.f32 %v473_v60, 0.0 }
 0x161   : > { %v1123_v61 = vpop.f32.mrf.mxu0  ;;  %1149 = vmatmul.mubr.bf16.gmra.mxu1 %v509_v59 }
 0x162   : > { %1200 = vmatpush3.bf16.msra.mxu1 %v1313_v28  ;;  %v503_v62 = vmax.f32 %v1123_v61, 0.0 }
 0x163   : > { %v476_v63 = vpop.f32.mrf.mxu0  ;;  %1193 = vmatprep.subr.bf16.mxu1 %v1314_v5 }
 0x164   : > { %v501_v1 = vmax.f32 %v476_v63, 0.0  ;;  %v511_v4 = vpack.c.bf16 %v503_v62, %v502_v2 }
 0x166   : > { %v510_v3 = vpack.c.bf16 %v501_v1, %v500_v0  ;;  %1201 = vmatpush3.bf16.msra.mxu1 %v1314_v5 }
 0x167   : > { %1194 = vmatprep.subr.bf16.mxu1 %v1315_v6 }
 0x168   : > { %1152 = vmatprep.mubr.bf16.mxu1 %v510_v3 }
 0x169   : > { %1153 = vmatmul.mubr.bf16.gmra.mxu1 %v511_v4 }
 0x16a   : > { %1202 = vmatpush3.bf16.msra.mxu1 %v1315_v6 }
 0x16b   : > { %1195 = vmatprep.subr.bf16.mxu1 %v1316_v7 }
 0x16e   : > { %1203 = vmatpush3.bf16.msra.mxu1 %v1316_v7 }
 0x211   : > { %v1142_v8 = vpop.f32.mrf.mxu1 }
 0x212   : > { %v675_v15 = vmax.f32 %v1142_v8, 0.0 }
 0x213   : > { %v610_v9 = vpop.f32.mrf.mxu1 }
 0x214   : > { %v673_v13 = vmax.f32 %v610_v9, 0.0 }
 0x215   : > { %v1143_v10 = vpop.f32.mrf.mxu1 }
 0x216   : > { %v676_v11 = vmax.f32 %v1143_v10, 0.0 }
 0x217   : > { %v613_v12 = vpop.f32.mrf.mxu1 }
 0x218   : > { %v674_v14 = vmax.f32 %v613_v12, 0.0  ;;  %v690_v18 = vpack.c.bf16 %v676_v11, %v675_v15 }
 0x219   : > { %v1146_v16 = vpop.f32.mrf.mxu1 }
 0x21a   : > { %v689_v17 = vpack.c.bf16 %v674_v14, %v673_v13  ;;  %v679_v25 = vmax.f32 %v1146_v16, 0.0 }
 0x21b   : > { %v626_v19 = vpop.f32.mrf.mxu1 }
 0x21c   : > { %1172 = vmatprep.mubr.bf16.mxu0 %v689_v17  ;;  %v677_v23 = vmax.f32 %v626_v19, 0.0 }
 0x21d   : > { %v1147_v20 = vpop.f32.mrf.mxu1  ;;  %1173 = vmatmul.mubr.bf16.vlgmr.msra.gmra.mxu0 %v690_v18 }
 0x21e   : > { %v680_v21 = vmax.f32 %v1147_v20, 0.0 }
 0x21f   : > { %v629_v22 = vpop.f32.mrf.mxu1 }
 0x220   : > { %v678_v24 = vmax.f32 %v629_v22, 0.0  ;;  %v692_v28 = vpack.c.bf16 %v680_v21, %v679_v25 }
 0x221   : > { %v1150_v26 = vpop.f32.mrf.mxu1 }
 0x222   : > { %v691_v27 = vpack.c.bf16 %v678_v24, %v677_v23  ;;  %v683_v35 = vmax.f32 %v1150_v26, 0.0 }
 0x223   : > { %v642_v29 = vpop.f32.mrf.mxu1 }
 0x224   : > { %1176 = vmatprep.mubr.bf16.mxu0 %v691_v27  ;;  %v681_v33 = vmax.f32 %v642_v29, 0.0 }
 0x225   : > { %v1151_v30 = vpop.f32.mrf.mxu1  ;;  %1177 = vmatmul.mubr.bf16.gmra.mxu0 %v692_v28 }
 0x226   : > { %v684_v31 = vmax.f32 %v1151_v30, 0.0 }
 0x227   : > { %v645_v32 = vpop.f32.mrf.mxu1 }
 0x228   : > { %v682_v34 = vmax.f32 %v645_v32, 0.0  ;;  %v694_v38 = vpack.c.bf16 %v684_v31, %v683_v35 }
 0x229   : > { %v1154_v36 = vpop.f32.mrf.mxu1 }
 0x22a   : > { %v693_v37 = vpack.c.bf16 %v682_v34, %v681_v33  ;;  %v687_v45 = vmax.f32 %v1154_v36, 0.0 }
 0x22b   : > { %v658_v39 = vpop.f32.mrf.mxu1 }
 0x22c   : > { %1180 = vmatprep.mubr.bf16.mxu1 %v693_v37  ;;  %v685_v43 = vmax.f32 %v658_v39, 0.0 }
 0x22d   : > { %v1155_v40 = vpop.f32.mrf.mxu1  ;;  %1181 = vmatmul.mubr.bf16.vlgmr.msra.gmra.mxu1 %v694_v38 }
 0x22e   : > { %v688_v41 = vmax.f32 %v1155_v40, 0.0 }
 0x22f   : > { %v661_v42 = vpop.f32.mrf.mxu1 }
 0x230   : > { %v686_v44 = vmax.f32 %v661_v42, 0.0  ;;  %v696_v47 = vpack.c.bf16 %v688_v41, %v687_v45 }
 0x232   : > { %v695_v46 = vpack.c.bf16 %v686_v44, %v685_v43 }
 0x234   : > { %1184 = vmatprep.mubr.bf16.mxu1 %v695_v46 }
 0x235   : > { %1185 = vmatmul.mubr.bf16.gmra.mxu1 %v696_v47 }
 0x2dd   : > { %v1174_v48 = vpop.f32.mrf.mxu0 }
 0x2de   : > { %860 = vst [vmem:[%s1705_s23 + $0x10] sm:$0xff] %v1174_v48 }
 0x2df   : > { %v795_v49 = vpop.f32.mrf.mxu0 }
 0x2e0   : > { %858 = vst [vmem:[%s1705_s23] sm:$0xff] %v795_v49 }
 0x2e1   : > { %v1175_v50 = vpop.f32.mrf.mxu0 }
 0x2e2   : > { %861 = vst [vmem:[%s1705_s23 + $0x18] sm:$0xff] %v1175_v50 }
 0x2e3   : > { %v798_v51 = vpop.f32.mrf.mxu0 }
 0x2e4   : > { %859 = vst [vmem:[%s1705_s23 + $0x8] sm:$0xff] %v798_v51 }
 0x2e5   : > { %v1178_v52 = vpop.f32.mrf.mxu0 }
 0x2e6   : > { %864 = vst [vmem:[%s1705_s23 + $0x30] sm:$0xff] %v1178_v52 }
 0x2e7   : > { %v811_v53 = vpop.f32.mrf.mxu0 }
 0x2e8   : > { %862 = vst [vmem:[%s1705_s23 + $0x20] sm:$0xff] %v811_v53 }
 0x2e9   : > { %v1179_v54 = vpop.f32.mrf.mxu0 }
 0x2ea   : > { %865 = vst [vmem:[%s1705_s23 + $0x38] sm:$0xff] %v1179_v54 }
 0x2eb   : > { %v814_v55 = vpop.f32.mrf.mxu0 }
 0x2ec   : > { %863 = vst [vmem:[%s1705_s23 + $0x28] sm:$0xff] %v814_v55 }
 0x2ed   : > { %v1182_v56 = vpop.f32.mrf.mxu1 }
 0x2ee   : > { %868 = vst [vmem:[%s1705_s23 + $0x50] sm:$0xff] %v1182_v56 }
 0x2ef   : > { %v827_v57 = vpop.f32.mrf.mxu1 }
 0x2f0   : > { %866 = vst [vmem:[%s1705_s23 + $0x40] sm:$0xff] %v827_v57 }
 0x2f1   : > { %v1183_v58 = vpop.f32.mrf.mxu1 }
 0x2f2   : > { %869 = vst [vmem:[%s1705_s23 + $0x58] sm:$0xff] %v1183_v58 }
 0x2f3   : > { %v830_v59 = vpop.f32.mrf.mxu1 }
 0x2f4   : > { %867 = vst [vmem:[%s1705_s23 + $0x48] sm:$0xff] %v830_v59 }
 0x2f5   : > { %v1186_v60 = vpop.f32.mrf.mxu1 }
 0x2f6   : > { %872 = vst [vmem:[%s1705_s23 + $0x70] sm:$0xff] %v1186_v60 }
 0x2f7   : > { %v843_v61 = vpop.f32.mrf.mxu1 }
 0x2f8   : > { %870 = vst [vmem:[%s1705_s23 + $0x60] sm:$0xff] %v843_v61 }
 0x2f9   : > { %v1187_v62 = vpop.f32.mrf.mxu1 }
 0x2fa   : > { %873 = vst [vmem:[%s1705_s23 + $0x78] sm:$0xff] %v1187_v62 }
 0x2fb   : > { %v846_v63 = vpop.f32.mrf.mxu1 }
 0x2fc   : > { %871 = vst [vmem:[%s1705_s23 + $0x68] sm:$0xff] %v846_v63 }
 0x2fd   : > { %1436 = shalt.err (!%p1433_p10)
}
 0x2fe   : > { %s1437_s11 = scalar_lea.hbm %s1726_s13, 2048  ;;  %s1441_s5 = scalar_lea.hbm %s1777_s4, 4096 }
 0x2ff   : > { %p1438_p6 = scmp.ne.s32.totalorder %s1726_s13, %s1437_s11  ;;  %p1442_p3 = scmp.lt.s32.totalorder %s1726_s13, %s1777_s4 }
 0x300   : > { %p1443_p11 = scmp.lt.s32.totalorder %s1441_s5, %s1437_s11 }
 0x301   : > { %p1439_p4 = pnand %p1438_p6, %p1794_p1 }
 0x302   : > { %p1444_p5 = por %p1443_p11, %p1442_p3 }
 0x303   : > { %p1440_p8 = pneg %p1439_p4 }
 0x305   : > { %p1445_p7 = pnand %p1444_p5, %p1440_p8 }
 0x307   : > { %1448 = shalt.err (!%p1445_p7)
}
 0x308   : > { %s1504_s23 = smov 128   ;;  %s1505_s6 = smov 8  }
 0x309   : > { %1218 = dma.vmem_to_hbm [thread:$0]  (%p1794_p1), %s1728_s7, 2048, %s1726_s13, %s875_s14, %s1504_s23, %s1504_s23, %s1505_s6  }
 0x30a PF: > { %s903_s10 = sand.u32 1, %s1483_s15   ;;  %p1795_p12 = scmp.ne.s32.totalorder %s1783_s22, 0 }
 0x30b   : > { %p1796_p9 = scmp.ge.s32.totalorder %s1495_s18, 2  ;;  %s904_s12 = scalar_lea.sflag [#allocation4], %s903_s10 }
 0x30d   : > { %p1235_p13 = pnand %p1796_p9, %p1795_p12 }
 0x30f   : > { %p1236_p0 = pneg %p1235_p13 }
 0x311   : > { %1478 = dma.done.wait (%p1236_p0), %s904_s12, 2048  }
 0x312   : > { %1480 = vsyncadd (%p1236_p0), %s904_s12, 4294965248  ;;  %p19_p2 = scmp.ge.s32.totalorder %s1620_s24, 4   ;;  %s1797_s15 = smov %s1487_s16 }
 0x313   : > { %s1798_s16 = smov %s1491_s17  ;;  %s1799_s17 = smov %s1630_s27 }
 0x314   : > { %s1800_s18 = smov %s1620_s24  ;;  %21 = sbr.rel (!%p19_p2) target bundleno = 7 (0x7), region = 93 }
 0x319   :  { %909 = vsyncpa [#allocation3], 1 }
 0x31a   :  { %911 = vsyncpa [#allocation3 + $0x1], 1 }
 0x31b   :  { %912 = vsyncpa [#allocation6], 1 }
 0x31c   :  { %913 = vsyncpa [#allocation9], 1 }
 0x31d   :  { %914 = vsyncpa [#allocation4], 1 }
 0x31e   :  { %916 = vsyncpa [#allocation4 + $0x1], 1 }

</bundles_post_ra>
